<compile_context>
chip_gen: v6e
topology: v6e:2x2x1
jax: 0.10.0
libtpu: 0.0.40
codegen_flags: <defaults>
</compile_context>

<pallas_src>
import math

import jax
import jax.numpy as jnp
from jax.experimental import pallas as pl
from jax.experimental.pallas import tpu as pltpu

_SUBLANE = 8
_LANE = 128
_VMEM_BUDGET = 40 * 1024 * 1024   # target working set
_VMEM_LIMIT = 48 * 1024 * 1024    # scoped limit passed to Mosaic (< 64 MiB v7x)


def _cdiv(a, b):
    return -(-a // b)


def _round_up(x, m):
    return _cdiv(x, m) * m


# ---------------------------------------------------------------------------
# Path A (common case): whole weight resident in VMEM, single grid axis.
# ---------------------------------------------------------------------------
def _mlr_kernel_resident_w(x_ref, wt_ref, b_ref, o_ref):
    # x_ref:  (TM, D)      x tile (streamed per batch tile)
    # wt_ref: (D, Cpad)    pre-transposed weight (constant index_map -> fetched once)
    # b_ref:  (1, Cpad)    bias (constant index_map -> resident)
    # o_ref:  (TM, Cpad)   output tile
    o_ref[...] = (
        jnp.dot(x_ref[...], wt_ref[...], preferred_element_type=jnp.float32)
        + b_ref[...]
    )


# ---------------------------------------------------------------------------
# Path B (large-D fallback): K-tiled reduction with an f32 VMEM accumulator.
# ---------------------------------------------------------------------------
def _mlr_kernel_ktiled(x_ref, wt_ref, b_ref, o_ref, acc_ref):
    k = pl.program_id(1)

    @pl.when(k == 0)
    def _():
        # Fold the bias into the accumulator init (saves a separate VPU add).
        acc_ref[...] = jnp.broadcast_to(b_ref[...], acc_ref.shape)

    acc_ref[...] += jnp.dot(
        x_ref[...], wt_ref[...], preferred_element_type=jnp.float32
    )

    @pl.when(k == pl.num_programs(1) - 1)
    def _():
        o_ref[...] = acc_ref[...]


def multinomial_logistic_regression(x, weight, bias, *, stream_dtype=None):
    """Forward pass of MultinomialLogisticRegression (Flatten + Linear).

    Args:
      x:      (B, ...) float; flattened per-sample (matches nn.Flatten).
      weight: (n_classes, n_inputs) float  (PyTorch nn.Linear layout).
      bias:   (n_classes,) float.
      stream_dtype: optional narrower dtype (e.g. jnp.bfloat16) for streaming
        x / W^T from HBM with f32 accumulation.  Default None keeps f32 and
        matches the PyTorch reference numerics.
    Returns:
      (B, n_classes) float32 logits (no softmax, matching the module).
    """
    batch = x.shape[0]
    n_classes, n_inputs = weight.shape

    xw_dtype = jnp.float32 if stream_dtype is None else jnp.dtype(stream_dtype)
    x_flat = x.reshape(batch, -1).astype(xw_dtype)
    assert x_flat.shape[1] == n_inputs
    x_item = jnp.dtype(xw_dtype).itemsize

    # Classes (N): pad to a lane-dense multiple of 128 (unmasked MXU/stores).
    c_pad = _round_up(n_classes, _LANE)

    # Bias as a (1, Cpad) f32 row — tiny, VMEM resident.
    b2 = jnp.pad(
        bias.astype(jnp.float32).reshape(1, n_classes),
        ((0, 0), (0, c_pad - n_classes)),
    )

    # ---- Balanced batch tiles --------------------------------------------
    # <= ~512 rows per tile; at least 2 tiles for non-tiny batches so the
    # "parallel" batch axis can shard across v7x's two TensorCores, and so
    # that unlucky sizes (e.g. B = 513) don't waste a near-full tile of DMA.
    if batch <= 16:
        n_m = 1
    else:
        n_m = max(_cdiv(batch, 512), 2)
    tm = _round_up(_cdiv(batch, n_m), _SUBLANE)

    def _vmem_need(tm_, tk_, with_acc):
        x_buf = 2 * tm_ * tk_ * x_item            # double-buffered x tile
        w_buf = 2 * tk_ * c_pad * x_item          # W^T tile (2x, conservative)
        o_buf = 2 * tm_ * c_pad * 4               # double-buffered output tile
        acc = tm_ * c_pad * 4 if with_acc else 0  # f32 accumulator scratch
        return x_buf + w_buf + o_buf + acc + c_pad * 4

    compiler_params = lambda sem: pltpu.CompilerParams(  # noqa: E731
        dimension_semantics=sem, vmem_limit_bytes=_VMEM_LIMIT
    )

    # ---- Path A: whole W^T resident, no K axis, no accumulator -------------
    tm_a = tm
    while tm_a > _SUBLANE and _vmem_need(tm_a, n_inputs, False) > _VMEM_BUDGET:
        tm_a = _round_up(max(tm_a // 2, _SUBLANE), _SUBLANE)

    if _vmem_need(tm_a, n_inputs, False) <= _VMEM_BUDGET:
        tm = tm_a
        grid_m = _cdiv(batch, tm)
        # Pre-transposed weight padded only along classes: (D, Cpad).  x needs
        # NO padding at all (full-D K block; ragged batch boundary block).
        # NOTE: for inference with static weights, hoist this transpose+pad
        # out of the per-call path.
        wt = jnp.pad(weight.astype(xw_dtype).T, ((0, 0), (0, c_pad - n_classes)))

        out = pl.pallas_call(
            _mlr_kernel_resident_w,
            out_shape=jax.ShapeDtypeStruct((batch, c_pad), jnp.float32),
            grid_spec=pltpu.PrefetchScalarGridSpec(
                num_scalar_prefetch=0,
                grid=(grid_m,),
                in_specs=[
                    pl.BlockSpec((tm, n_inputs), lambda i: (i, 0)),      # x tiles
                    pl.BlockSpec((n_inputs, c_pad), lambda i: (0, 0)),   # W^T (resident)
                    pl.BlockSpec((1, c_pad), lambda i: (0, 0)),          # bias (resident)
                ],
                out_specs=pl.BlockSpec((tm, c_pad), lambda i: (i, 0)),
            ),
            compiler_params=compiler_params(("parallel",)),
        )(x_flat, wt, b2)
        return out[:, :n_classes]

    # ---- Path B: very large D — K-tiled reduction with f32 accumulator -----
    tk = 2048
    while tk > _LANE and _vmem_need(tm, tk, True) > _VMEM_BUDGET:
        tk //= 2
    while tm > _SUBLANE and _vmem_need(tm, tk, True) > _VMEM_BUDGET:
        tm = _round_up(max(tm // 2, _SUBLANE), _SUBLANE)

    d_pad = _round_up(n_inputs, tk)
    # Pad x along K only when tk does not divide D: OOB K data is garbage and
    # would corrupt the reduction (batch-axis OOB stays un-padded / masked).
    x_k = x_flat if d_pad == n_inputs else jnp.pad(
        x_flat, ((0, 0), (0, d_pad - n_inputs))
    )
    wt = jnp.pad(
        weight.astype(xw_dtype).T,
        ((0, d_pad - n_inputs), (0, c_pad - n_classes)),
    )
    grid = (_cdiv(batch, tm), d_pad // tk)

    out = pl.pallas_call(
        _mlr_kernel_ktiled,
        out_shape=jax.ShapeDtypeStruct((batch, c_pad), jnp.float32),
        grid_spec=pltpu.PrefetchScalarGridSpec(
            num_scalar_prefetch=0,
            grid=grid,
            in_specs=[
                pl.BlockSpec((tm, tk), lambda i, k: (i, k)),       # x tiles
                pl.BlockSpec((tk, c_pad), lambda i, k: (k, 0)),    # W^T tiles
                pl.BlockSpec((1, c_pad), lambda i, k: (0, 0)),     # bias (resident)
            ],
            out_specs=pl.BlockSpec((tm, c_pad), lambda i, k: (i, 0)),
            scratch_shapes=[pltpu.VMEM((tm, c_pad), jnp.float32)],
        ),
        compiler_params=compiler_params(("parallel", "arbitrary")),
    )(x_k, wt, b2)
    return out[:, :n_classes]


if __name__ == "__main__":
    # Small shapes consistent with the module: image-like input flattened to
    # n_inputs features, n_classes outputs.
    B, C, H, W = 2, 4, 16, 16
    n_inputs = C * H * W          # 1024
    n_classes = 10

    key = jax.random.PRNGKey(0)
    kx, kw, kb = jax.random.split(key, 3)

    x = jax.random.normal(kx, (B, C, H, W), dtype=jnp.float32)

    # Deterministic init mimicking nn.Linear's uniform(-1/sqrt(in), 1/sqrt(in)).
    bound = 1.0 / math.sqrt(n_inputs)
    weight = jax.random.uniform(
        kw, (n_classes, n_inputs), minval=-bound, maxval=bound, dtype=jnp.float32
    )
    bias = jax.random.uniform(
        kb, (n_classes,), minval=-bound, maxval=bound, dtype=jnp.float32
    )

    out = multinomial_logistic_regression(x, weight, bias)
    out = jax.block_until_ready(out)

    # Reference check in plain JAX.
    ref = x.reshape(B, -1) @ weight.T + bias
    assert out.shape == (B, n_classes)
    assert jnp.allclose(out, ref, atol=1e-5, rtol=1e-5)

    print("KERNEL_OK")
</pallas_src>

<mosaic_0001>
module attributes {stable_mosaic.version = 11 : i64} {
  func.func @_mlr_kernel_resident_w(%arg0: i32, %arg1: memref<8x1024xf32, #tpu.memory_space<vmem>>, %arg2: memref<1024x128xf32, #tpu.memory_space<vmem>>, %arg3: memref<1x128xf32, #tpu.memory_space<vmem>>, %arg4: memref<8x128xf32, #tpu.memory_space<vmem>>) attributes {dimension_semantics = [#tpu.dimension_semantics<parallel>], iteration_bounds = array<i64: 1>, scalar_prefetch = 0 : i64, scratch_operands = 0 : i64, tpu.core_type = #tpu.core_type<tc>, window_params = [{transform_indices = @transform_0, window_bounds = array<i64: 8, 1024>}, {pipeline_mode = #tpu.pipeline_mode<synchronous>, transform_indices = @transform_1, window_bounds = array<i64: 1024, 128>}, {pipeline_mode = #tpu.pipeline_mode<synchronous>, transform_indices = @transform_2, window_bounds = array<i64: 1, 128>}, {transform_indices = @transform_3, window_bounds = array<i64: 8, 128>}]} {
    %c0 = arith.constant 0 : index
    %c0_0 = arith.constant 0 : index
    %0 = vector.load %arg1[%c0, %c0_0] : memref<8x1024xf32, #tpu.memory_space<vmem>>, vector<8x1024xf32>
    %c0_1 = arith.constant 0 : index
    %c0_2 = arith.constant 0 : index
    %1 = vector.load %arg2[%c0_1, %c0_2] : memref<1024x128xf32, #tpu.memory_space<vmem>>, vector<1024x128xf32>
    %cst = arith.constant dense<0.000000e+00> : vector<8x128xf32>
    %2 = tpu.matmul %0, %1, %cst {dimension_numbers = #tpu.dot_dimension_numbers<[1], [0], [0], [1], [0, 0, 1, 1], [], []>} : vector<8x1024xf32>, vector<1024x128xf32>, vector<8x128xf32> -> vector<8x128xf32>
    %c0_3 = arith.constant 0 : index
    %c0_4 = arith.constant 0 : index
    %3 = vector.load %arg3[%c0_3, %c0_4] : memref<1x128xf32, #tpu.memory_space<vmem>>, vector<1x128xf32>
    %4 = vector.broadcast %3 : vector<1x128xf32> to vector<8x128xf32>
    %5 = arith.addf %2, %4 : vector<8x128xf32>
    %c0_5 = arith.constant 0 : index
    %c0_6 = arith.constant 0 : index
    %6 = vector.load %arg4[%c0_5, %c0_6] : memref<8x128xf32, #tpu.memory_space<vmem>>, vector<8x128xf32>
    tpu.vector_store %arg4[%c0_5, %c0_6], %5 {strides = array<i32>} : memref<8x128xf32, #tpu.memory_space<vmem>>, vector<8x128xf32>,
    return
  }
  func.func @transform_0(%arg0: i32) -> (i32, i32) {
    %c0_i32 = arith.constant 0 : i32
    %c0_i32_0 = arith.constant 0 : i32
    return %arg0, %c0_i32 : i32, i32
  }
  func.func @transform_1(%arg0: i32) -> (i32, i32) {
    %c0_i32 = arith.constant 0 : i32
    %c0_i32_0 = arith.constant 0 : i32
    %c0_i32_1 = arith.constant 0 : i32
    return %c0_i32, %c0_i32_0 : i32, i32
  }
  func.func @transform_2(%arg0: i32) -> (i32, i32) {
    %c0_i32 = arith.constant 0 : i32
    %c0_i32_0 = arith.constant 0 : i32
    %c0_i32_1 = arith.constant 0 : i32
    return %c0_i32, %c0_i32_0 : i32, i32
  }
  func.func @transform_3(%arg0: i32) -> (i32, i32) {
    %c0_i32 = arith.constant 0 : i32
    %c0_i32_0 = arith.constant 0 : i32
    return %arg0, %c0_i32 : i32, i32
  }
}

</mosaic_0001>

<bundles_post_ra>
// kernel: tpu_custom_call.1
= control target key start
LH: loop header
LB: loop body
LE: loop exit
PB: predicated region body
PF: predicated region fallthrough
CT: control target
= control target key end

     0   :  { %8 = vsyncpa [#allocation3], 0  ;;  %s854_s0 = inlined_call_operand.hbm [shape: f32[2,1024], index: 0, kind: input, shape index: {}]   ;;  %s855_s1 = inlined_call_operand.hbm [shape: f32[1024,128], index: 1, kind: input, shape index: {}]   ;;  %s856_s2 = inlined_call_operand.vmem [shape: f32[1,128], index: 2, kind: input, shape index: {}]   ;;  %s857_s3 = inlined_call_operand.hbm [shape: f32[2,128], index: 3, kind: output, shape index: {}]  }
   0x1   :  { %9 = vsyncpa [#allocation6], 0 }
   0x2   :  { %10 = vsyncpa [#allocation4], 0 }
   0x3   :  { %15 = vsyncadd [#allocation3], 768  ;;  %s802_s12 = smov [#allocation2]  }
   0x4   :  { %s16_s13 = sshll.u32 %s802_s12, 4  ;;  %s17_s13 = int_to_ptr.vmem [resolvable:$true] %s16_s13 }
   0x5   :  { %s744_s14 = scalar_lea.vmem %s17_s13, 256  ;;  %s748_s15 = scalar_lea.vmem %s17_s13, 1024 }
   0x6   :  { %p745_p0 = scmp.ne.s32.totalorder %s17_s13, %s744_s14  ;;  %p749_p1 = scmp.lt.s32.totalorder %s17_s13, %s17_s13 }
   0x7   :  { %p750_p2 = scmp.lt.s32.totalorder %s748_s15, %s744_s14 }
   0x9   :  { %p751_p3 = por %p750_p2, %p749_p1 }
   0xb   :  { %p752_p4 = pnand %p751_p3, %p745_p0 }
   0xd   :  { %755 = shalt.err (!%p752_p4)
}
   0xe   :  { %s803_s16 = smov 256   ;;  %s804_s17 = smov 16  }
   0xf   :  { %22 = dma.hbm_to_vmem [thread:$0]  %s854_s0, 256, %s17_s13, [#allocation3], %s803_s16, %s803_s16, %s804_s17  }
  0x10   :  { %s805_s20 = smov [#allocation5]  }
  0x11   :  { %s28_s21 = sshll.u32 %s805_s20, 4  ;;  %s29_s21 = int_to_ptr.vmem [resolvable:$true] %s28_s21 }
  0x12   :  { %s764_s22 = scalar_lea.vmem %s29_s21, 16384  ;;  %p769_p6 = scmp.lt.s32.totalorder %s29_s21, %s29_s21 }
  0x13   :  { %p765_p5 = scmp.ne.s32.totalorder %s29_s21, %s764_s22  ;;  %p770_p7 = scmp.lt.s32.totalorder %s764_s22, %s764_s22 }
  0x15   :  { %p771_p8 = por %p770_p7, %p769_p6 }
  0x17   :  { %p772_p9 = pnand %p771_p8, %p765_p5 }
  0x19   :  { %775 = shalt.err (!%p772_p9)
}
  0x1a   :  { %s806_s23 = smov 128   ;;  %s807_s24 = smov 8  }
  0x1b   :  { %34 = dma.hbm_to_vmem [thread:$0]  %s855_s1, 16384, %s29_s21, [#allocation6], %s806_s23, %s806_s23, %s807_s24  }
  0x1c   :  { %796 = dma.done.wait [#allocation3], 1024  }
  0x1d   :  { %797 = vsyncadd [#allocation3], 4294966272 }
  0x1e   :  { %798 = dma.done.wait [#allocation6], 16384  }
  0x1f   :  { %799 = vsyncadd [#allocation6], 4294950912  ;;  %v82_v0 = vld [vmem:[#allocation5 + $0xf8] sm:$0xff]  ;;  %v81_v4 = vld [vmem:[#allocation5 + $0xf0] sm:$0xff]  ;;  %v808_v30 = vmov 1983009808   ;;  %v201_v32 = vlaneseq }
  0x20   :  { %v114_v1 = vld [vmem:[#allocation5 + $0x1f8] sm:$0xff]  ;;  %574 = vmatprep.subr.mxu0 %v82_v0  ;;  %v113_v5 = vld [vmem:[#allocation5 + $0x1f0] sm:$0xff]  ;;  %v80_v8 = vld [vmem:[#allocation5 + $0xe8] sm:$0xff]  ;;  %v199_v31 = vunpack.c.l.s4 %v808_v30 }
  0x21   :  { %v66_v2 = vld [vmem:[#allocation5 + $0x78] sm:$0xff]  ;;  %609 = vmatprep.subr.mxu1 %v114_v1  ;;  %v65_v6 = vld [vmem:[#allocation5 + $0x70] sm:$0xff]  ;;  %v112_v9 = vld [vmem:[#allocation5 + $0x1e8] sm:$0xff]  ;;  %v202_v42 = vshrl.u32 %v201_v32, 7 }
  0x22   :  { %v98_v3 = vld [vmem:[#allocation5 + $0x178] sm:$0xff]  ;;  %575 = vmatpush3.msra.mxu0 %v66_v2  ;;  %v97_v7 = vld [vmem:[#allocation5 + $0x170] sm:$0xff]  ;;  %v64_v10 = vld [vmem:[#allocation5 + $0x68] sm:$0xff]  ;;  %v200_v41 = vunpack.c.0.s8 %v199_v31 }
  0x23   :  { %610 = vmatpush3.msra.mxu1 %v98_v3  ;;  %576 = vmatprep.subr.mxu0 %v81_v4  ;;  %v96_v11 = vld [vmem:[#allocation5 + $0x168] sm:$0xff]  ;;  %v79_v12 = vld [vmem:[#allocation5 + $0xe0] sm:$0xff]  ;;  %v78_v16 = vld [vmem:[#allocation5 + $0xd8] sm:$0xff] }
  0x24   :  { %611 = vmatprep.subr.mxu1 %v113_v5  ;;  %577 = vmatpush3.msra.mxu0 %v65_v6  ;;  %v111_v13 = vld [vmem:[#allocation5 + $0x1e0] sm:$0xff]  ;;  %v110_v17 = vld [vmem:[#allocation5 + $0x1d8] sm:$0xff]  ;;  %v77_v20 = vld [vmem:[#allocation5 + $0xd0] sm:$0xff]  ;;  %v838_v55 = vsub.s32 %v200_v41, %v202_v42 }
  0x25   :  { %612 = vmatpush3.msra.mxu1 %v97_v7  ;;  %578 = vmatprep.subr.mxu0 %v80_v8  ;;  %v63_v14 = vld [vmem:[#allocation5 + $0x60] sm:$0xff]  ;;  %v62_v18 = vld [vmem:[#allocation5 + $0x58] sm:$0xff]  ;;  %v109_v21 = vld [vmem:[#allocation5 + $0x1d0] sm:$0xff] }
  0x26   :  { %613 = vmatprep.subr.mxu1 %v112_v9  ;;  %v95_v15 = vld [vmem:[#allocation5 + $0x160] sm:$0xff]  ;;  %579 = vmatpush3.msra.mxu0 %v64_v10  ;;  %v94_v19 = vld [vmem:[#allocation5 + $0x158] sm:$0xff]  ;;  %v61_v22 = vld [vmem:[#allocation5 + $0x50] sm:$0xff] }
  0x27   :  { %614 = vmatpush3.msra.mxu1 %v96_v11  ;;  %580 = vmatprep.subr.mxu0 %v79_v12  ;;  %v93_v23 = vld [vmem:[#allocation5 + $0x150] sm:$0xff]  ;;  %v76_v24 = vld [vmem:[#allocation5 + $0xc8] sm:$0xff]  ;;  %v75_v28 = vld [vmem:[#allocation5 + $0xc0] sm:$0xff] }
  0x28   :  { %615 = vmatprep.subr.mxu1 %v111_v13  ;;  %581 = vmatpush3.msra.mxu0 %v63_v14  ;;  %v108_v25 = vld [vmem:[#allocation5 + $0x1c8] sm:$0xff]  ;;  %v107_v29 = vld [vmem:[#allocation5 + $0x1c0] sm:$0xff]  ;;  %v74_v35 = vld [vmem:[#allocation5 + $0xb8] sm:$0xff] }
  0x29   :  { %616 = vmatpush3.msra.mxu1 %v95_v15  ;;  %582 = vmatprep.subr.mxu0 %v78_v16  ;;  %v60_v26 = vld [vmem:[#allocation5 + $0x48] sm:$0xff]  ;;  %v59_v33 = vld [vmem:[#allocation5 + $0x40] sm:$0xff]  ;;  %v106_v36 = vld [vmem:[#allocation5 + $0x1b8] sm:$0xff] }
  0x2a   :  { %617 = vmatprep.subr.mxu1 %v110_v17  ;;  %583 = vmatpush3.msra.mxu0 %v62_v18  ;;  %v92_v27 = vld [vmem:[#allocation5 + $0x148] sm:$0xff]  ;;  %v91_v34 = vld [vmem:[#allocation5 + $0x140] sm:$0xff]  ;;  %v58_v37 = vld [vmem:[#allocation5 + $0x38] sm:$0xff] }
  0x2b   :  { %618 = vmatpush3.msra.mxu1 %v94_v19  ;;  %584 = vmatprep.subr.mxu0 %v77_v20  ;;  %v90_v38 = vld [vmem:[#allocation5 + $0x138] sm:$0xff]  ;;  %v73_v39 = vld [vmem:[#allocation5 + $0xb0] sm:$0xff]  ;;  %v72_v45 = vld [vmem:[#allocation5 + $0xa8] sm:$0xff] }
  0x2c   :  { %619 = vmatprep.subr.mxu1 %v109_v21  ;;  %585 = vmatpush3.msra.mxu0 %v61_v22  ;;  %v105_v40 = vld [vmem:[#allocation5 + $0x1b0] sm:$0xff]  ;;  %v104_v46 = vld [vmem:[#allocation5 + $0x1a8] sm:$0xff]  ;;  %v71_v49 = vld [vmem:[#allocation5 + $0xa0] sm:$0xff] }
  0x2d   :  { %620 = vmatpush3.msra.mxu1 %v93_v23  ;;  %586 = vmatprep.subr.mxu0 %v76_v24  ;;  %v57_v43 = vld [vmem:[#allocation5 + $0x30] sm:$0xff]  ;;  %v56_v47 = vld [vmem:[#allocation5 + $0x28] sm:$0xff]  ;;  %v103_v50 = vld [vmem:[#allocation5 + $0x1a0] sm:$0xff] }
  0x2e   :  { %621 = vmatprep.subr.mxu1 %v108_v25  ;;  %587 = vmatpush3.msra.mxu0 %v60_v26  ;;  %v89_v44 = vld [vmem:[#allocation5 + $0x130] sm:$0xff]  ;;  %v88_v48 = vld [vmem:[#allocation5 + $0x128] sm:$0xff]  ;;  %v55_v51 = vld [vmem:[#allocation5 + $0x20] sm:$0xff] }
  0x2f   :  { %622 = vmatpush3.msra.mxu1 %v92_v27  ;;  %588 = vmatprep.subr.mxu0 %v75_v28  ;;  %v87_v52 = vld [vmem:[#allocation5 + $0x120] sm:$0xff]  ;;  %v70_v53 = vld [vmem:[#allocation5 + $0x98] sm:$0xff]  ;;  %v69_v62 = vld [vmem:[#allocation5 + $0x90] sm:$0xff] }
  0x30   :  { %623 = vmatprep.subr.mxu1 %v107_v29  ;;  %589 = vmatpush3.msra.mxu0 %v59_v33  ;;  %v102_v54 = vld [vmem:[#allocation5 + $0x198] sm:$0xff]  ;;  %v724_v57 = vld [vmem:[#allocation2] ss:$16 sps:$4 sm:$0xff]   ;;  %v728_v60 = vld [vmem:[#allocation2 + $0x4] ss:$16 sps:$4 sm:$0xff]  }
  0x31   :  { %624 = vmatpush3.msra.mxu1 %v91_v34  ;;  %590 = vmatprep.subr.mxu0 %v74_v35  ;;  %v54_v56 = vld [vmem:[#allocation5 + $0x18] sm:$0xff]  ;;  %v726_v58 = vld [vmem:[#allocation2 + $0x20] ss:$16 sps:$4 sm:$0xff]   ;;  %v729_v61 = vld [vmem:[#allocation2 + $0x24] ss:$16 sps:$4 sm:$0xff]   ;;  %v204_v0 = vrot.slane %v724_v57, %v838_v55  ;;  %v211_v6 = vrot.slane %v728_v60, %v838_v55 }
  0x32   :  { %625 = vmatprep.subr.mxu1 %v106_v36  ;;  %591 = vmatpush3.msra.mxu0 %v58_v37  ;;  %v86_v59 = vld [vmem:[#allocation5 + $0x118] sm:$0xff]  ;;  %v101_v63 = vld [vmem:[#allocation5 + $0x190] sm:$0xff]  ;;  %v218_v1 = vrot.slane %v726_v58, %v838_v55  ;;  %v68_v4 = vld [vmem:[#allocation5 + $0x88] sm:$0xff]  ;;  %v225_v7 = vrot.slane %v729_v61, %v838_v55 }
  0x33   :  { %626 = vmatpush3.msra.mxu1 %v90_v38  ;;  %592 = vmatprep.subr.mxu0 %v73_v39  ;;  %v53_v2 = vld [vmem:[#allocation5 + $0x10] sm:$0xff]  ;;  %v100_v5 = vld [vmem:[#allocation5 + $0x188] sm:$0xff]  ;;  %v67_v10 = vld [vmem:[#allocation5 + $0x80] sm:$0xff] }
  0x34   :  { %627 = vmatprep.subr.mxu1 %v105_v40  ;;  %593 = vmatpush3.msra.mxu0 %v57_v43  ;;  %v85_v3 = vld [vmem:[#allocation5 + $0x110] sm:$0xff]  ;;  %v52_v8 = vld [vmem:[#allocation5 + $0x8] sm:$0xff]  ;;  %v99_v11 = vld [vmem:[#allocation5 + $0x180] sm:$0xff]  ;;  %v227_v12 = vcombine.high %v204_v0, %v218_v1  ;;  %v226_v14 = vcombine.low %v204_v0, %v218_v1  ;;  %v229_v16 = vcombine.high %v211_v6, %v225_v7 }
  0x35   :  { %628 = vmatpush3.msra.mxu1 %v89_v44  ;;  %594 = vmatprep.subr.mxu0 %v72_v45  ;;  %v84_v9 = vld [vmem:[#allocation5 + $0x108] sm:$0xff]  ;;  %v51_v13 = vld [vmem:[#allocation5] sm:$0xff]  ;;  %v146_v17 = vld [vmem:[#allocation5 + $0x2f8] sm:$0xff]  ;;  %v228_v18 = vcombine.low %v211_v6, %v225_v7 }
  0x36   :  { %629 = vmatprep.subr.mxu1 %v104_v46  ;;  %595 = vmatpush3.msra.mxu0 %v56_v47  ;;  %v83_v15 = vld [vmem:[#allocation5 + $0x100] sm:$0xff]  ;;  %v178_v19 = vld [vmem:[#allocation5 + $0x3f8] sm:$0xff]  ;;  %v145_v22 = vld [vmem:[#allocation5 + $0x2f0] sm:$0xff] }
  0x37   :  { %630 = vmatpush3.msra.mxu1 %v88_v48  ;;  %596 = vmatprep.subr.mxu0 %v71_v49  ;;  %v130_v20 = vld [vmem:[#allocation5 + $0x278] sm:$0xff]  ;;  %v177_v23 = vld [vmem:[#allocation5 + $0x3f0] sm:$0xff]  ;;  %v144_v26 = vld [vmem:[#allocation5 + $0x2e8] sm:$0xff] }
  0x38   :  { %631 = vmatprep.subr.mxu1 %v103_v50  ;;  %597 = vmatpush3.msra.mxu0 %v55_v51  ;;  %v162_v21 = vld [vmem:[#allocation5 + $0x378] sm:$0xff]  ;;  %v129_v24 = vld [vmem:[#allocation5 + $0x270] sm:$0xff]  ;;  %v176_v27 = vld [vmem:[#allocation5 + $0x3e8] sm:$0xff] }
  0x39   :  { %632 = vmatpush3.msra.mxu1 %v87_v52  ;;  %598 = vmatprep.subr.mxu0 %v70_v53  ;;  %v161_v25 = vld [vmem:[#allocation5 + $0x370] sm:$0xff]  ;;  %v128_v28 = vld [vmem:[#allocation5 + $0x268] sm:$0xff]  ;;  %v143_v30 = vld [vmem:[#allocation5 + $0x2e0] sm:$0xff] }
  0x3a   :  { %633 = vmatprep.subr.mxu1 %v102_v54  ;;  %599 = vmatpush3.msra.mxu0 %v54_v56  ;;  %v160_v29 = vld [vmem:[#allocation5 + $0x368] sm:$0xff]  ;;  %v175_v31 = vld [vmem:[#allocation5 + $0x3e0] sm:$0xff]  ;;  %v142_v34 = vld [vmem:[#allocation5 + $0x2d8] sm:$0xff] }
  0x3b   :  { %634 = vmatpush3.msra.mxu1 %v86_v59  ;;  %600 = vmatprep.subr.mxu0 %v69_v62  ;;  %v127_v32 = vld [vmem:[#allocation5 + $0x260] sm:$0xff]  ;;  %v174_v35 = vld [vmem:[#allocation5 + $0x3d8] sm:$0xff]  ;;  %v141_v38 = vld [vmem:[#allocation5 + $0x2d0] sm:$0xff] }
  0x3c   :  { %635 = vmatprep.subr.mxu1 %v101_v63  ;;  %601 = vmatpush3.msra.mxu0 %v53_v2  ;;  %v159_v33 = vld [vmem:[#allocation5 + $0x360] sm:$0xff]  ;;  %v126_v36 = vld [vmem:[#allocation5 + $0x258] sm:$0xff]  ;;  %v173_v39 = vld [vmem:[#allocation5 + $0x3d0] sm:$0xff] }
  0x3d   :  { %636 = vmatpush3.msra.mxu1 %v85_v3  ;;  %602 = vmatprep.subr.mxu0 %v68_v4  ;;  %v158_v37 = vld [vmem:[#allocation5 + $0x358] sm:$0xff]  ;;  %v125_v40 = vld [vmem:[#allocation5 + $0x250] sm:$0xff]  ;;  %v140_v42 = vld [vmem:[#allocation5 + $0x2c8] sm:$0xff] }
  0x3e   :  { %637 = vmatprep.subr.mxu1 %v100_v5  ;;  %603 = vmatpush3.msra.mxu0 %v52_v8  ;;  %v157_v41 = vld [vmem:[#allocation5 + $0x350] sm:$0xff]  ;;  %v172_v43 = vld [vmem:[#allocation5 + $0x3c8] sm:$0xff]  ;;  %v139_v46 = vld [vmem:[#allocation5 + $0x2c0] sm:$0xff] }
  0x3f   :  { %638 = vmatpush3.msra.mxu1 %v84_v9  ;;  %604 = vmatprep.subr.mxu0 %v67_v10  ;;  %v124_v44 = vld [vmem:[#allocation5 + $0x248] sm:$0xff]  ;;  %v171_v47 = vld [vmem:[#allocation5 + $0x3c0] sm:$0xff]  ;;  %v138_v50 = vld [vmem:[#allocation5 + $0x2b8] sm:$0xff] }
  0x40   :  { %639 = vmatprep.subr.mxu1 %v99_v11  ;;  %605 = vmatpush3.msra.mxu0 %v51_v13  ;;  %v156_v45 = vld [vmem:[#allocation5 + $0x348] sm:$0xff]  ;;  %v123_v48 = vld [vmem:[#allocation5 + $0x240] sm:$0xff]  ;;  %v170_v51 = vld [vmem:[#allocation5 + $0x3b8] sm:$0xff] }
  0x41   :  { %338 = vmatprep.mubr.f32.mxu0 %v227_v12  ;;  %640 = vmatpush3.msra.mxu1 %v83_v15  ;;  %v155_v49 = vld [vmem:[#allocation5 + $0x340] sm:$0xff]  ;;  %v122_v52 = vld [vmem:[#allocation5 + $0x238] sm:$0xff]  ;;  %v137_v54 = vld [vmem:[#allocation5 + $0x2b0] sm:$0xff] }
  0x42   :  { %339 = vmatmul.mubr.f32.vlgmr.msra.gmra.mxu0 %v226_v14  ;;  %408 = vmatprep.mubr.f32.mxu1 %v229_v16  ;;  %v154_v53 = vld [vmem:[#allocation5 + $0x338] sm:$0xff]  ;;  %v169_v56 = vld [vmem:[#allocation5 + $0x3b0] sm:$0xff]  ;;  %v136_v59 = vld [vmem:[#allocation5 + $0x2a8] sm:$0xff] }
  0x43   :  { %644 = vmatprep.subr.mxu0 %v146_v17  ;;  %679 = vmatprep.subr.mxu1 %v178_v19  ;;  %v121_v57 = vld [vmem:[#allocation5 + $0x230] sm:$0xff]  ;;  %v168_v60 = vld [vmem:[#allocation5 + $0x3a8] sm:$0xff]  ;;  %v135_v63 = vld [vmem:[#allocation5 + $0x2a0] sm:$0xff] }
  0x44   :  { %409 = vmatmul.mubr.f32.vlgmr.msra.gmra.mxu1 %v228_v18  ;;  %645 = vmatpush3.msra.mxu0 %v130_v20  ;;  %v153_v58 = vld [vmem:[#allocation5 + $0x330] sm:$0xff]  ;;  %v120_v61 = vld [vmem:[#allocation5 + $0x228] sm:$0xff]  ;;  %v167_v0 = vld [vmem:[#allocation5 + $0x3a0] sm:$0xff] }
  0x45   :  { %680 = vmatpush3.msra.mxu1 %v162_v21  ;;  %646 = vmatprep.subr.mxu0 %v145_v22  ;;  %v152_v62 = vld [vmem:[#allocation5 + $0x328] sm:$0xff]  ;;  %v119_v1 = vld [vmem:[#allocation5 + $0x220] sm:$0xff]  ;;  %v134_v7 = vld [vmem:[#allocation5 + $0x298] sm:$0xff] }
  0x46   :  { %681 = vmatprep.subr.mxu1 %v177_v23  ;;  %647 = vmatpush3.msra.mxu0 %v129_v24  ;;  %v730_v2 = vld [vmem:[#allocation2 + $0x8] ss:$16 sps:$4 sm:$0xff]   ;;  %v151_v4 = vld [vmem:[#allocation5 + $0x320] sm:$0xff]  ;;  %v734_v5 = vld [vmem:[#allocation2 + $0xc] ss:$16 sps:$4 sm:$0xff]  }
  0x47   :  { %682 = vmatpush3.msra.mxu1 %v161_v25  ;;  %648 = vmatprep.subr.mxu0 %v144_v26  ;;  %v732_v3 = vld [vmem:[#allocation2 + $0x28] ss:$16 sps:$4 sm:$0xff]   ;;  %v735_v6 = vld [vmem:[#allocation2 + $0x2c] ss:$16 sps:$4 sm:$0xff]   ;;  %v133_v11 = vld [vmem:[#allocation5 + $0x290] sm:$0xff]  ;;  %v240_v13 = vrot.slane %v730_v2, %v838_v55  ;;  %v247_v17 = vrot.slane %v734_v5, %v838_v55 }
  0x48   :  { %683 = vmatprep.subr.mxu1 %v176_v27  ;;  %649 = vmatpush3.msra.mxu0 %v128_v28  ;;  %v166_v8 = vld [vmem:[#allocation5 + $0x398] sm:$0xff]  ;;  %v165_v12 = vld [vmem:[#allocation5 + $0x390] sm:$0xff]  ;;  %v254_v14 = vrot.slane %v732_v3, %v838_v55  ;;  %v261_v18 = vrot.slane %v735_v6, %v838_v55  ;;  %v132_v19 = vld [vmem:[#allocation5 + $0x288] sm:$0xff] }
  0x49   :  { %684 = vmatpush3.msra.mxu1 %v160_v29  ;;  %650 = vmatprep.subr.mxu0 %v143_v30  ;;  %v118_v9 = vld [vmem:[#allocation5 + $0x218] sm:$0xff]  ;;  %v117_v15 = vld [vmem:[#allocation5 + $0x210] sm:$0xff]  ;;  %v164_v20 = vld [vmem:[#allocation5 + $0x388] sm:$0xff] }
  0x4a   :  { %685 = vmatprep.subr.mxu1 %v175_v31  ;;  %651 = vmatpush3.msra.mxu0 %v127_v32  ;;  %v150_v10 = vld [vmem:[#allocation5 + $0x318] sm:$0xff]  ;;  %v149_v16 = vld [vmem:[#allocation5 + $0x310] sm:$0xff]  ;;  %v116_v21 = vld [vmem:[#allocation5 + $0x208] sm:$0xff]  ;;  %v263_v25 = vcombine.high %v240_v13, %v254_v14  ;;  %v265_v27 = vcombine.high %v247_v17, %v261_v18  ;;  %v262_v28 = vcombine.low %v240_v13, %v254_v14 }
  0x4b   :  { %686 = vmatpush3.msra.mxu1 %v159_v33  ;;  %652 = vmatprep.subr.mxu0 %v142_v34  ;;  %v148_v22 = vld [vmem:[#allocation5 + $0x308] sm:$0xff]  ;;  %v131_v23 = vld [vmem:[#allocation5 + $0x280] sm:$0xff]  ;;  %v264_v29 = vcombine.low %v247_v17, %v261_v18 }
  0x4c   :  { %687 = vmatprep.subr.mxu1 %v174_v35  ;;  %653 = vmatpush3.msra.mxu0 %v126_v36  ;;  %v163_v24 = vld [vmem:[#allocation5 + $0x380] sm:$0xff] }
  0x4d   :  { %688 = vmatpush3.msra.mxu1 %v158_v37  ;;  %654 = vmatprep.subr.mxu0 %v141_v38  ;;  %v115_v26 = vld [vmem:[#allocation5 + $0x200] sm:$0xff] }
  0x4e   :  { %689 = vmatprep.subr.mxu1 %v173_v39  ;;  %655 = vmatpush3.msra.mxu0 %v125_v40  ;;  %v147_v55 = vld [vmem:[#allocation5 + $0x300] sm:$0xff] }
  0x4f   :  { %690 = vmatpush3.msra.mxu1 %v157_v41  ;;  %656 = vmatprep.subr.mxu0 %v140_v42  ;;  %v573_v34 = vld [vmem:[%s856_s2] ss:$0 sm:$0xff] }
  0x50   :  { %691 = vmatprep.subr.mxu1 %v172_v43  ;;  %657 = vmatpush3.msra.mxu0 %v124_v44 }
  0x51   :  { %692 = vmatpush3.msra.mxu1 %v156_v45  ;;  %658 = vmatprep.subr.mxu0 %v139_v46 }
  0x52   :  { %693 = vmatprep.subr.mxu1 %v171_v47  ;;  %659 = vmatpush3.msra.mxu0 %v123_v48 }
  0x53   :  { %694 = vmatpush3.msra.mxu1 %v155_v49  ;;  %660 = vmatprep.subr.mxu0 %v138_v50 }
  0x54   :  { %695 = vmatprep.subr.mxu1 %v170_v51  ;;  %661 = vmatpush3.msra.mxu0 %v122_v52 }
  0x55   :  { %696 = vmatpush3.msra.mxu1 %v154_v53  ;;  %662 = vmatprep.subr.mxu0 %v137_v54 }
  0x56   :  { %697 = vmatprep.subr.mxu1 %v169_v56  ;;  %663 = vmatpush3.msra.mxu0 %v121_v57 }
  0x57   :  { %698 = vmatpush3.msra.mxu1 %v153_v58  ;;  %664 = vmatprep.subr.mxu0 %v136_v59 }
  0x58   :  { %699 = vmatprep.subr.mxu1 %v168_v60  ;;  %665 = vmatpush3.msra.mxu0 %v120_v61 }
  0x59   :  { %700 = vmatpush3.msra.mxu1 %v152_v62  ;;  %666 = vmatprep.subr.mxu0 %v135_v63 }
  0x5a   :  { %701 = vmatprep.subr.mxu1 %v167_v0  ;;  %667 = vmatpush3.msra.mxu0 %v119_v1 }
  0x5b   :  { %702 = vmatpush3.msra.mxu1 %v151_v4  ;;  %668 = vmatprep.subr.mxu0 %v134_v7 }
  0x5c   :  { %703 = vmatprep.subr.mxu1 %v166_v8  ;;  %669 = vmatpush3.msra.mxu0 %v118_v9 }
  0x5d   :  { %704 = vmatpush3.msra.mxu1 %v150_v10  ;;  %670 = vmatprep.subr.mxu0 %v133_v11 }
  0x5e   :  { %705 = vmatprep.subr.mxu1 %v165_v12  ;;  %671 = vmatpush3.msra.mxu0 %v117_v15 }
  0x5f   :  { %706 = vmatpush3.msra.mxu1 %v149_v16  ;;  %672 = vmatprep.subr.mxu0 %v132_v19 }
  0x60   :  { %707 = vmatprep.subr.mxu1 %v164_v20  ;;  %673 = vmatpush3.msra.mxu0 %v116_v21 }
  0x61   :  { %708 = vmatpush3.msra.mxu1 %v148_v22  ;;  %674 = vmatprep.subr.mxu0 %v131_v23 }
  0x62   :  { %709 = vmatprep.subr.mxu1 %v163_v24  ;;  %675 = vmatpush3.msra.mxu0 %v115_v26 }
  0x63   :  { %478 = vmatprep.mubr.f32.mxu0 %v263_v25  ;;  %710 = vmatpush3.msra.mxu1 %v147_v55 }
  0x64   :  { %548 = vmatprep.mubr.f32.mxu1 %v265_v27  ;;  %479 = vmatmul.mubr.f32.vlgmr.msra.gmra.mxu0 %v262_v28 }
  0x65   :  { %549 = vmatmul.mubr.f32.vlgmr.msra.gmra.mxu1 %v264_v29 }
 0x102   :  { %v606_v30 = vpop.f32.mrf.mxu0 }
 0x104   :  { %v641_v31 = vpop.f32.mrf.mxu1  ;;  %v607_v32 = vpop.f32.mrf.mxu0 }
 0x105   :  { %v608_v33 = vadd.f32 %v607_v32, %v606_v30 }
 0x106   :  { %v642_v35 = vpop.f32.mrf.mxu1 }
 0x107   :  { %v341_v36 = vadd.f32 %v608_v33, %v573_v34  ;;  %v643_v37 = vadd.f32 %v642_v35, %v641_v31 }
 0x109   :  { %v411_v42 = vadd.f32 %v643_v37, %v341_v36 }
 0x124   :  { %v676_v38 = vpop.f32.mrf.mxu0 }
 0x125   :  { %v711_v39 = vpop.f32.mrf.mxu1 }
 0x126   :  { %v677_v40 = vpop.f32.mrf.mxu0 }
 0x127   :  { %v712_v41 = vpop.f32.mrf.mxu1  ;;  %v678_v43 = vadd.f32 %v677_v40, %v676_v38 }
 0x128   :  { %v713_v45 = vadd.f32 %v712_v41, %v711_v39 }
 0x129   :  { %v481_v44 = vadd.f32 %v678_v43, %v411_v42 }
 0x12b   :  { %v551_v46 = vadd.f32 %v713_v45, %v481_v44 }
 0x12d   :  { %554 = vst [vmem:[#allocation7] sm:$0xff] %v551_v46 }
 0x12e   :  { %559 = vsyncadd [#allocation4], 96  ;;  %s809_s27 = smov [#allocation7]  }
 0x12f   :  { %s560_s28 = sshll.u32 %s809_s27, 4  ;;  %s561_s28 = int_to_ptr.vmem [resolvable:$true] %s560_s28 }
 0x130   :  { %s776_s29 = scalar_lea.vmem %s561_s28, 32  ;;  %s780_s2 = scalar_lea.vmem %s561_s28, 128 }
 0x131   :  { %p777_p10 = scmp.ne.s32.totalorder %s561_s28, %s776_s29  ;;  %p781_p11 = scmp.lt.s32.totalorder %s561_s28, %s561_s28 }
 0x132   :  { %p782_p12 = scmp.lt.s32.totalorder %s780_s2, %s776_s29 }
 0x134   :  { %p783_p13 = por %p782_p12, %p781_p11 }
 0x136   :  { %p784_p0 = pnand %p783_p13, %p777_p10 }
 0x138   :  { %787 = shalt.err (!%p784_p0)
}
 0x139   :  { %s810_s30 = smov 32   ;;  %s811_s4 = smov 2  }
 0x13a   :  { %566 = dma.vmem_to_hbm [thread:$0]  %s561_s28, 32, %s857_s3, [#allocation4], %s810_s30, %s810_s30, %s811_s4  }
 0x13b   :  { %800 = dma.done.wait [#allocation4], 128  }
 0x13c   :  { %801 = vsyncadd [#allocation4], 4294967168 }
 0x13d   :  { %570 = vsyncpa [#allocation3], 1 }
 0x13e   :  { %571 = vsyncpa [#allocation6], 1 }
 0x13f   :  { %572 = vsyncpa [#allocation4], 1 }

</bundles_post_ra>
